<compile_context>
chip_gen: v5e
topology: v5e:2x2
jax: 0.10.0
libtpu: 0.0.40
codegen_flags: <defaults>
</compile_context>

<pallas_src>
import jax
import jax.numpy as jnp
from jax.experimental import pallas as pl
from jax.experimental.pallas import tpu as pltpu


def _round_up(x: int, m: int) -> int:
    return ((x + m - 1) // m) * m


def _linear_sigmoid_kernel(x_ref, w_ref, b_ref, o_ref):
    # x_ref: (F, tB) f32 in VMEM (feature-major, batch along lanes)
    # w_ref: (F,)    f32 in SMEM (resident, read as scalars)
    # b_ref: (1,)    f32 in SMEM
    # o_ref: (1, tB) f32 in VMEM (lane-dense output slab)
    x = x_ref[...]
    n_feat, t_b = x.shape
    # Statically-unrolled multiply-accumulate on the VPU (no MXU push/pop).
    acc = jnp.zeros((1, t_b), dtype=jnp.float32)
    for f in range(n_feat):  # n_feat == 5, static unroll
        acc = acc + w_ref[f] * x[f:f + 1, :]
    acc = acc + b_ref[0]
    # logistic lowers to the EUP (exp + recip), VALU slots stay free.
    o_ref[...] = jax.nn.sigmoid(acc)


def net_forward(x, weight, bias, *, block_b: int = 512):
    """Forward pass of Net: sigmoid(x @ weight.T + bias).

    x:      (B, 5) float32   -- PyTorch Linear input layout
    weight: (1, 5) float32   -- PyTorch Linear weight layout (out, in)
    bias:   (1,)   float32
    returns (B, 1) float32
    """
    B, F = x.shape
    OUT = weight.shape[0]
    assert OUT == 1 and weight.shape[1] == F

    # Lane-dense, feature-major layout: batch along the 128-wide lane axis.
    # Tile <= 512 columns keeps per-block VMEM tiny (safe for v7x's 64 MiB).
    t_b = min(block_b, _round_up(max(B, 1), 128))
    p_b = _round_up(B, t_b)

    x_t = jnp.zeros((F, p_b), dtype=jnp.float32).at[:, :B].set(x.T)
    w_vec = weight.reshape(F).astype(jnp.float32)
    b_vec = bias.reshape(1).astype(jnp.float32)

    out_1b = pl.pallas_call(
        _linear_sigmoid_kernel,
        out_shape=jax.ShapeDtypeStruct((OUT, p_b), jnp.float32),
        grid=(p_b // t_b,),
        in_specs=[
            # Batch-tiled activations, streamed/pipelined over the grid.
            pl.BlockSpec((F, t_b), lambda i: (0, i)),
            # Parameters: whole-array, resident in SMEM across all grid steps.
            pl.BlockSpec(memory_space=pltpu.MemorySpace.SMEM),
            pl.BlockSpec(memory_space=pltpu.MemorySpace.SMEM),
        ],
        out_specs=pl.BlockSpec((OUT, t_b), lambda i: (0, i)),
        compiler_params=pltpu.CompilerParams(
            # Batch tiles are independent -> shard across TCs on v7x.
            dimension_semantics=("parallel",),
        ),
    )(x_t, w_vec, b_vec)

    # Back to PyTorch output layout (B, 1), dropping the lane padding.
    return out_1b[:, :B].T


if __name__ == "__main__":
    key = jax.random.PRNGKey(0)
    k_x, k_w, k_b = jax.random.split(key, 3)

    B, F, OUT = 8, 5, 1  # Linear(5, 1), small Titanic-style batch

    x = jax.random.normal(k_x, (B, F), dtype=jnp.float32)

    # PyTorch Linear default init: U(-1/sqrt(fan_in), 1/sqrt(fan_in)).
    bound = 1.0 / jnp.sqrt(jnp.float32(F))
    weight = jax.random.uniform(k_w, (OUT, F), minval=-bound, maxval=bound,
                                dtype=jnp.float32)
    bias = jax.random.uniform(k_b, (OUT,), minval=-bound, maxval=bound,
                              dtype=jnp.float32)

    out = net_forward(x, weight, bias)
    out = jax.block_until_ready(out)

    # Reference in plain JAX (same math as the PyTorch module).
    ref = jax.nn.sigmoid(x @ weight.T + bias)
    assert out.shape == (B, OUT), out.shape
    assert jnp.allclose(out, ref, atol=1e-6, rtol=1e-6), (out, ref)

    print("KERNEL_OK")
</pallas_src>

<mosaic_0001>
module attributes {stable_mosaic.version = 11 : i64} {
  func.func @_linear_sigmoid_kernel(%arg0: i32, %arg1: memref<5x128xf32, #tpu.memory_space<vmem>>, %arg2: memref<5xf32, #tpu.memory_space<smem>>, %arg3: memref<1xf32, #tpu.memory_space<smem>>, %arg4: memref<1x128xf32, #tpu.memory_space<vmem>>) attributes {dimension_semantics = [#tpu.dimension_semantics<parallel>], iteration_bounds = array<i64: 1>, scalar_prefetch = 0 : i64, scratch_operands = 0 : i64, tpu.core_type = #tpu.core_type<tc>, window_params = [{transform_indices = @transform_0, window_bounds = array<i64: 5, 128>}, {transform_indices = @transform_1, window_bounds = array<i64: 5>}, {transform_indices = @transform_2, window_bounds = array<i64: 1>}, {transform_indices = @transform_3, window_bounds = array<i64: 1, 128>}]} {
    %c0 = arith.constant 0 : index
    %c0_0 = arith.constant 0 : index
    %0 = vector.load %arg1[%c0, %c0_0] : memref<5x128xf32, #tpu.memory_space<vmem>>, vector<5x128xf32>
    %cst = arith.constant 0.000000e+00 : f32
    %1 = vector.broadcast %cst : f32 to vector<1x128xf32>
    %c0_1 = arith.constant 0 : index
    %2 = memref.load %arg2[%c0_1] : memref<5xf32, #tpu.memory_space<smem>>
    %3 = vector.extract_strided_slice %0 {offsets = [0, 0], sizes = [1, 128], strides = [1, 1]} : vector<5x128xf32> to vector<1x128xf32>
    %4 = vector.broadcast %2 : f32 to vector<1x128xf32>
    %5 = arith.mulf %4, %3 : vector<1x128xf32>
    %6 = arith.addf %1, %5 : vector<1x128xf32>
    %c1 = arith.constant 1 : index
    %7 = memref.load %arg2[%c1] : memref<5xf32, #tpu.memory_space<smem>>
    %8 = vector.extract_strided_slice %0 {offsets = [1, 0], sizes = [1, 128], strides = [1, 1]} : vector<5x128xf32> to vector<1x128xf32>
    %9 = vector.broadcast %7 : f32 to vector<1x128xf32>
    %10 = arith.mulf %9, %8 : vector<1x128xf32>
    %11 = arith.addf %6, %10 : vector<1x128xf32>
    %c2 = arith.constant 2 : index
    %12 = memref.load %arg2[%c2] : memref<5xf32, #tpu.memory_space<smem>>
    %13 = vector.extract_strided_slice %0 {offsets = [2, 0], sizes = [1, 128], strides = [1, 1]} : vector<5x128xf32> to vector<1x128xf32>
    %14 = vector.broadcast %12 : f32 to vector<1x128xf32>
    %15 = arith.mulf %14, %13 : vector<1x128xf32>
    %16 = arith.addf %11, %15 : vector<1x128xf32>
    %c3 = arith.constant 3 : index
    %17 = memref.load %arg2[%c3] : memref<5xf32, #tpu.memory_space<smem>>
    %18 = vector.extract_strided_slice %0 {offsets = [3, 0], sizes = [1, 128], strides = [1, 1]} : vector<5x128xf32> to vector<1x128xf32>
    %19 = vector.broadcast %17 : f32 to vector<1x128xf32>
    %20 = arith.mulf %19, %18 : vector<1x128xf32>
    %21 = arith.addf %16, %20 : vector<1x128xf32>
    %c4 = arith.constant 4 : index
    %22 = memref.load %arg2[%c4] : memref<5xf32, #tpu.memory_space<smem>>
    %23 = vector.extract_strided_slice %0 {offsets = [4, 0], sizes = [1, 128], strides = [1, 1]} : vector<5x128xf32> to vector<1x128xf32>
    %24 = vector.broadcast %22 : f32 to vector<1x128xf32>
    %25 = arith.mulf %24, %23 : vector<1x128xf32>
    %26 = arith.addf %21, %25 : vector<1x128xf32>
    %c0_2 = arith.constant 0 : index
    %27 = memref.load %arg3[%c0_2] : memref<1xf32, #tpu.memory_space<smem>>
    %28 = vector.broadcast %27 : f32 to vector<1x128xf32>
    %29 = arith.addf %26, %28 : vector<1x128xf32>
    %30 = arith.negf %29 : vector<1x128xf32>
    %31 = math.exp %30 : vector<1x128xf32>
    %cst_3 = arith.constant 1.000000e+00 : f32
    %32 = vector.broadcast %cst_3 : f32 to vector<1x128xf32>
    %33 = arith.addf %32, %31 : vector<1x128xf32>
    %34 = arith.divf %32, %33 : vector<1x128xf32>
    %c0_4 = arith.constant 0 : index
    %c0_5 = arith.constant 0 : index
    %35 = vector.load %arg4[%c0_4, %c0_5] : memref<1x128xf32, #tpu.memory_space<vmem>>, vector<1x128xf32>
    tpu.vector_store %arg4[%c0_4, %c0_5], %34 {strides = array<i32>} : memref<1x128xf32, #tpu.memory_space<vmem>>, vector<1x128xf32>,
    return
  }
  func.func @transform_0(%arg0: i32) -> (i32, i32) {
    %c0_i32 = arith.constant 0 : i32
    %c0_i32_0 = arith.constant 0 : i32
    return %c0_i32, %arg0 : i32, i32
  }
  func.func @transform_1(%arg0: i32) -> i32 {
    %c0_i32 = arith.constant 0 : i32
    %c0_i32_0 = arith.constant 0 : i32
    return %c0_i32 : i32
  }
  func.func @transform_2(%arg0: i32) -> i32 {
    %c0_i32 = arith.constant 0 : i32
    %c0_i32_0 = arith.constant 0 : i32
    return %c0_i32 : i32
  }
  func.func @transform_3(%arg0: i32) -> (i32, i32) {
    %c0_i32 = arith.constant 0 : i32
    %c0_i32_0 = arith.constant 0 : i32
    return %c0_i32, %arg0 : i32, i32
  }
}

</mosaic_0001>

<bundles_post_ra>
// kernel: tpu_custom_call.1
= control target key start
LH: loop header
LB: loop body
LE: loop exit
PB: predicated region body
PF: predicated region fallthrough
CT: control target
= control target key end

     0   :  { %9 = vsyncpa [#allocation4], 0  ;;  %s230_s0 = inlined_call_operand.hbm [shape: f32[5,128], index: 0, kind: input, shape index: {}]   ;;  %s231_s1 = inlined_call_operand.vmem [shape: f32[5], index: 1, kind: input, shape index: {}]   ;;  %s232_s2 = inlined_call_operand.<no memory space> [shape: f32[1], index: 2, kind: input, shape index: {}]   ;;  %s233_s3 = inlined_call_operand.hbm [shape: f32[1,128], index: 3, kind: output, shape index: {}]  }
   0x1   :  { %10 = vsyncpa [#allocation6], 0 }
   0x2   :  { %11 = vsyncpa [#allocation5], 0  ;;  %s17_s14 = sshll.u32 %s230_s0, 4  ;;  %s195_s15 = smov [#allocation3]   ;;  %s18_s14 = int_to_ptr.hbm [resolvable:$true] %s17_s14 }
   0x3   :  { %s19_s16 = sshll.u32 %s195_s15, 4  ;;  %s28_s19 = sshll.u32 %s231_s1, 4  ;;  %s20_s16 = int_to_ptr.vmem [resolvable:$true] %s19_s16  ;;  %s29_s19 = int_to_ptr.vmem [resolvable:$true] %s28_s19 }
   0x4   :  { %22 = dma.hbm_to_vmem [thread:$0]  %s18_s14, 128, %s20_s16, [#allocation4]  }
   0x5   :  { %s196_s20 = smov [#allocation7]  }
   0x6   :  { %31 = dma.vmem_to_smem %s29_s19, 16, %s196_s20, [#allocation6]  }
   0x7   :  { %189 = dma.done.wait [#allocation4], 128  }
   0x8   :  { %190 = vsyncadd [#allocation4], 4294967168 }
   0x9   :  { %191 = dma.done.wait [#allocation6], 16  }
   0xa   :  { %192 = vsyncadd [#allocation6], 4294967280 }
   0xb   :  { %42 = sfence }
   0xc   :  { %s44_s21 = sld [smem:[#allocation7]]  ;;  %v43_v0 = vld [vmem:[#allocation3] sm:$0x1f]  ;;  %v77_v18 = vstv %s232_s2  ;;  %s197_s26 = smov [#allocation8]  }
   0xd   :  { %s117_s22 = sld [smem:[#allocation7 + $0x1]]  ;;  %s104_s27 = sshll.u32 %s197_s26, 4  ;;  %s105_s27 = int_to_ptr.vmem [resolvable:$true] %s104_s27 }
   0xe   :  { %s118_s0 = sld [smem:[#allocation7 + $0x2]]  ;;  %s106_s29 = sshll.u32 %s233_s3, 4  ;;  %s107_s29 = int_to_ptr.hbm [resolvable:$true] %s106_s29 }
   0xf   :  { %s119_s23 = sld [smem:[#allocation7 + $0x3]] }
  0x10   :  { %s120_s24 = sld [smem:[#allocation7 + $0x4]] }
  0x12   :  { %v45_v1 = vstv %s44_s21 }
  0x13   :  { %v49_v2 = vstv %s117_s22  ;;  %v46_v3 = vmul.f32 %v45_v1, %v43_v0 }
  0x14   :  { %v50_v4 = vmul.f32 %v49_v2, %v43_v0  ;;  %v56_v5 = vstv %s118_s0 }
  0x15   :  { %v57_v6 = vmul.f32 %v56_v5, %v43_v0  ;;  %v63_v7 = vstv %s119_s23 }
  0x16   :  { %v52_v8 = vrot.slane %v50_v4, 1  ;;  %v64_v9 = vmul.f32 %v63_v7, %v43_v0  ;;  %v70_v10 = vstv %s120_s24 }
  0x17   :  { %v59_v11 = vrot.slane %v57_v6, 2  ;;  %v71_v12 = vmul.f32 %v70_v10, %v43_v0 }
  0x18   :  { %v54_v13 = vadd.f32 %v52_v8, %v46_v3  ;;  %v66_v14 = vrot.slane %v64_v9, 3 }
  0x19   :  { %v73_v16 = vrot.slane %v71_v12, 4 }
  0x1a   :  { %v61_v15 = vadd.f32 %v59_v11, %v54_v13 }
  0x1c   :  { %v68_v17 = vadd.f32 %v66_v14, %v61_v15 }
  0x1e   :  { %v75_v19 = vadd.f32 %v73_v16, %v68_v17 }
  0x20   :  { %v78_v20 = vadd.f32 %v77_v18, %v75_v19 }
  0x22   :  { %v121_v21 = vmul.f32 -1.442695, %v78_v20 }
  0x24   :  { %125 = vpow2.f32 %v121_v21 }
  0x2a   :  { %v126_v22 = vpop.eup %125 }
  0x2b   :  { %v82_v23 = vadd.f32 1.0, %v126_v22 }
  0x2d   :  { %127 = vrcp.f32 %v82_v23  ;;  %v94_v26 = vand.u32 2147483648, %v82_v23  ;;  %vm88_vm0 = vweird.f32 %v82_v23  ;;  %v92_v28 = vand.u32 2147483647, %v82_v23 }
  0x2f   :  { %v95_v30 = vor.u32 1.1754944e-38, %v94_v26  ;;  %vm93_vm3 = vcmp.eq.f32.partialorder %v92_v28, 8.507059e+37 }
  0x33   :  { %v128_v24 = vpop.eup %127 }
  0x34   :  { %v84_v25 = vmul.f32 %v128_v24, %v82_v23  ;;  %vm89_vm1 = vweird.f32 %v128_v24 }
  0x35   :  { %vm90_vm2 = vmor %vm88_vm0, %vm89_vm1 }
  0x36   :  { %v85_v27 = vsub.f32 1.0, %v84_v25 }
  0x38   :  { %v86_v29 = vmul.f32 %v128_v24, %v85_v27 }
  0x3a   :  { %v87_v31 = vadd.f32 %v128_v24, %v86_v29 }
  0x3c   :  { %v91_v32 = vsel %vm90_vm2, %v128_v24, %v87_v31 }
  0x3d   :  { %v96_v33 = vsel %vm93_vm3, %v95_v30, %v91_v32 }
  0x3e   :  { %98 = vst [vmem:[#allocation8] sm:$0x1] %v96_v33 }
  0x3f   :  { %109 = dma.vmem_to_hbm [thread:$0]  %s105_s27, 16, %s107_s29, [#allocation5]  }
  0x40   :  { %193 = dma.done.wait [#allocation5], 16  }
  0x41   :  { %194 = vsyncadd [#allocation5], 4294967280 }
  0x42   :  { %114 = vsyncpa [#allocation4], 1 }
  0x43   :  { %115 = vsyncpa [#allocation5], 1 }
  0x44   :  { %116 = vsyncpa [#allocation6], 1 }

</bundles_post_ra>
